<compile_context>
chip_gen: v7x
topology: tpu7x:2x2x1
jax: 0.10.0
libtpu: 0.0.40
codegen_flags: <defaults>
</compile_context>

<pallas_src>
import jax
import jax.numpy as jnp
from jax.experimental import pallas as pl
from jax.experimental.pallas import tpu as pltpu


def ddqn_mlp_kernel(x_ref,
                    w1_ref, b1_ref,
                    w2_ref, b2_ref,
                    w3_ref, b3_ref,
                    w4_ref, b4_ref,
                    o_ref):
    """Fused forward pass: relu(fc1) -> relu(fc2) -> relu(fc3) -> fc4.

    Weights arrive in bf16; matmul inputs are bf16, accumulation is f32.
    """
    cdt = w1_ref.dtype  # compute (MXU input) dtype, bfloat16

    x = x_ref[...].astype(cdt)
    h = jnp.dot(x, w1_ref[...], preferred_element_type=jnp.float32) + b1_ref[...]
    h = jnp.maximum(h, 0.0)

    h = jnp.dot(h.astype(cdt), w2_ref[...],
                preferred_element_type=jnp.float32) + b2_ref[...]
    h = jnp.maximum(h, 0.0)

    h = jnp.dot(h.astype(cdt), w3_ref[...],
                preferred_element_type=jnp.float32) + b3_ref[...]
    h = jnp.maximum(h, 0.0)

    out = jnp.dot(h.astype(cdt), w4_ref[...],
                  preferred_element_type=jnp.float32) + b4_ref[...]
    o_ref[...] = out.astype(o_ref.dtype)


def _round_up(x, m):
    return ((x + m - 1) // m) * m


def _full_block_spec(shape):
    # Whole-array block, constant index regardless of the batch grid step.
    return pl.BlockSpec(shape, lambda i: (0,) * len(shape))


def ddqn_forward(state, params, *, batch_block=256):
    """Fused DoubleDQN forward via a single Pallas kernel.

    state : [B, input_dims] float32
    params: dict of f32 weights (pre-transposed to [in, out]) and biases
            ([1, out]).  Weights are cast to bf16 here; biases stay f32.
    """
    B, D = state.shape
    n_actions = params["w4"].shape[1]

    # --- lane-dense output padding (4 -> 128) -------------------------------
    n_pad = _round_up(max(n_actions, 1), 128)

    # --- bf16 weights (f32 accumulation in-kernel), f32 biases --------------
    w1 = params["w1"].astype(jnp.bfloat16)
    w2 = params["w2"].astype(jnp.bfloat16)
    w3 = params["w3"].astype(jnp.bfloat16)
    w4 = jnp.pad(params["w4"], ((0, 0), (0, n_pad - n_actions))).astype(jnp.bfloat16)
    b1, b2, b3 = params["b1"], params["b2"], params["b3"]
    b4 = jnp.pad(params["b4"], ((0, 0), (0, n_pad - n_actions)))

    # --- batch tiling: weights stay VMEM-resident across batch blocks -------
    if B >= batch_block:
        bb = batch_block
        B_pad = _round_up(B, bb)
    else:
        B_pad = _round_up(B, 8)     # sublane alignment
        bb = B_pad                  # single block for small/inference batches
    x = jnp.pad(state, ((0, B_pad - B), (0, 0)))
    grid = (pl.cdiv(B_pad, bb),)

    in_specs = [
        pl.BlockSpec((bb, D), lambda i: (i, 0)),      # state: tiled over batch
        _full_block_spec(w1.shape), _full_block_spec(b1.shape),
        _full_block_spec(w2.shape), _full_block_spec(b2.shape),
        _full_block_spec(w3.shape), _full_block_spec(b3.shape),
        _full_block_spec(w4.shape), _full_block_spec(b4.shape),
    ]
    out_spec = pl.BlockSpec((bb, n_pad), lambda i: (i, 0))

    out = pl.pallas_call(
        ddqn_mlp_kernel,
        out_shape=jax.ShapeDtypeStruct((B_pad, n_pad), jnp.float32),
        grid=grid,
        in_specs=in_specs,
        out_specs=out_spec,
        compiler_params=pltpu.CompilerParams(
            dimension_semantics=("parallel",),   # shard batch blocks across TCs (v7x)
        ),
    )(x, w1, b1, w2, b2, w3, b3, w4, b4)

    return out[:B, :n_actions]


def init_params(key, input_dim, n_actions):
    """Deterministic synthetic parameter init (shapes match the torch module)."""
    dims = [(input_dim, 256), (256, 512), (512, 512), (512, n_actions)]
    params = {}
    for i, (d_in, d_out) in enumerate(dims, start=1):
        key, kw, kb = jax.random.split(key, 3)
        bound = 1.0 / jnp.sqrt(d_in)
        # stored as [in, out] (transposed vs. torch's [out, in])
        params[f"w{i}"] = jax.random.uniform(kw, (d_in, d_out), jnp.float32,
                                             minval=-bound, maxval=bound)
        params[f"b{i}"] = jax.random.uniform(kb, (1, d_out), jnp.float32,
                                             minval=-bound, maxval=bound)
    return params


def reference_forward(state, params, compute_dtype=jnp.bfloat16):
    """XLA reference mirroring the kernel's quantization (bf16 MXU inputs,
    f32 accumulation, f32 biases)."""
    def layer(x, w, b, relu):
        y = jnp.dot(x.astype(compute_dtype), w.astype(compute_dtype),
                    preferred_element_type=jnp.float32) + b
        return jnp.maximum(y, 0.0) if relu else y

    h = layer(state, params["w1"], params["b1"], True)
    h = layer(h, params["w2"], params["b2"], True)
    h = layer(h, params["w3"], params["b3"], True)
    return layer(h, params["w4"], params["b4"], False)


if __name__ == "__main__":
    key = jax.random.PRNGKey(0)
    batch = 8
    input_dim = 32      # input_dims = (32,)
    n_actions = 4

    key, ks = jax.random.split(key)
    state = jax.random.normal(ks, (batch, input_dim), jnp.float32)
    params = init_params(key, input_dim, n_actions)

    actions = ddqn_forward(state, params)
    actions = jax.block_until_ready(actions)

    ref = reference_forward(state, params)
    assert actions.shape == (batch, n_actions)
    assert jnp.allclose(actions, ref, atol=1e-2, rtol=1e-2)

    print("KERNEL_OK")
</pallas_src>

<mosaic_0001>
module attributes {stable_mosaic.version = 11 : i64} {
  func.func @ddqn_mlp_kernel(%arg0: i32, %arg1: memref<8x32xf32, #tpu.memory_space<vmem>>, %arg2: memref<32x256xbf16, #tpu.memory_space<vmem>>, %arg3: memref<1x256xf32, #tpu.memory_space<vmem>>, %arg4: memref<256x512xbf16, #tpu.memory_space<vmem>>, %arg5: memref<1x512xf32, #tpu.memory_space<vmem>>, %arg6: memref<512x512xbf16, #tpu.memory_space<vmem>>, %arg7: memref<1x512xf32, #tpu.memory_space<vmem>>, %arg8: memref<512x128xbf16, #tpu.memory_space<vmem>>, %arg9: memref<1x128xf32, #tpu.memory_space<vmem>>, %arg10: memref<8x128xf32, #tpu.memory_space<vmem>>) attributes {dimension_semantics = [#tpu.dimension_semantics<parallel>], iteration_bounds = array<i64: 1>, scalar_prefetch = 0 : i64, scratch_operands = 0 : i64, tpu.core_type = #tpu.core_type<tc>, window_params = [{transform_indices = @transform_0, window_bounds = array<i64: 8, 32>}, {pipeline_mode = #tpu.pipeline_mode<synchronous>, transform_indices = @transform_1, window_bounds = array<i64: 32, 256>}, {pipeline_mode = #tpu.pipeline_mode<synchronous>, transform_indices = @transform_2, window_bounds = array<i64: 1, 256>}, {pipeline_mode = #tpu.pipeline_mode<synchronous>, transform_indices = @transform_3, window_bounds = array<i64: 256, 512>}, {pipeline_mode = #tpu.pipeline_mode<synchronous>, transform_indices = @transform_4, window_bounds = array<i64: 1, 512>}, {pipeline_mode = #tpu.pipeline_mode<synchronous>, transform_indices = @transform_5, window_bounds = array<i64: 512, 512>}, {pipeline_mode = #tpu.pipeline_mode<synchronous>, transform_indices = @transform_6, window_bounds = array<i64: 1, 512>}, {pipeline_mode = #tpu.pipeline_mode<synchronous>, transform_indices = @transform_7, window_bounds = array<i64: 512, 128>}, {pipeline_mode = #tpu.pipeline_mode<synchronous>, transform_indices = @transform_8, window_bounds = array<i64: 1, 128>}, {transform_indices = @transform_9, window_bounds = array<i64: 8, 128>}]} {
    %c0 = arith.constant 0 : index
    %c0_0 = arith.constant 0 : index
    %0 = vector.load %arg1[%c0, %c0_0] : memref<8x32xf32, #tpu.memory_space<vmem>>, vector<8x32xf32>
    %1 = arith.truncf %0 : vector<8x32xf32> to vector<8x32xbf16>
    %c0_1 = arith.constant 0 : index
    %c0_2 = arith.constant 0 : index
    %2 = vector.load %arg2[%c0_1, %c0_2] : memref<32x256xbf16, #tpu.memory_space<vmem>>, vector<32x256xbf16>
    %cst = arith.constant dense<0.000000e+00> : vector<8x256xf32>
    %3 = tpu.matmul %1, %2, %cst {dimension_numbers = #tpu.dot_dimension_numbers<[1], [0], [0], [1], [0, 0, 1, 1], [], []>} : vector<8x32xbf16>, vector<32x256xbf16>, vector<8x256xf32> -> vector<8x256xf32>
    %c0_3 = arith.constant 0 : index
    %c0_4 = arith.constant 0 : index
    %4 = vector.load %arg3[%c0_3, %c0_4] : memref<1x256xf32, #tpu.memory_space<vmem>>, vector<1x256xf32>
    %5 = vector.broadcast %4 : vector<1x256xf32> to vector<8x256xf32>
    %6 = arith.addf %3, %5 : vector<8x256xf32>
    %cst_5 = arith.constant 0.000000e+00 : f32
    %7 = vector.broadcast %cst_5 : f32 to vector<8x256xf32>
    %8 = arith.maximumf %6, %7 : vector<8x256xf32>
    %9 = arith.truncf %8 : vector<8x256xf32> to vector<8x256xbf16>
    %c0_6 = arith.constant 0 : index
    %c0_7 = arith.constant 0 : index
    %10 = vector.load %arg4[%c0_6, %c0_7] : memref<256x512xbf16, #tpu.memory_space<vmem>>, vector<256x512xbf16>
    %cst_8 = arith.constant dense<0.000000e+00> : vector<8x512xf32>
    %11 = tpu.matmul %9, %10, %cst_8 {dimension_numbers = #tpu.dot_dimension_numbers<[1], [0], [0], [1], [0, 0, 1, 1], [], []>} : vector<8x256xbf16>, vector<256x512xbf16>, vector<8x512xf32> -> vector<8x512xf32>
    %c0_9 = arith.constant 0 : index
    %c0_10 = arith.constant 0 : index
    %12 = vector.load %arg5[%c0_9, %c0_10] : memref<1x512xf32, #tpu.memory_space<vmem>>, vector<1x512xf32>
    %13 = vector.broadcast %12 : vector<1x512xf32> to vector<8x512xf32>
    %14 = arith.addf %11, %13 : vector<8x512xf32>
    %cst_11 = arith.constant 0.000000e+00 : f32
    %15 = vector.broadcast %cst_11 : f32 to vector<8x512xf32>
    %16 = arith.maximumf %14, %15 : vector<8x512xf32>
    %17 = arith.truncf %16 : vector<8x512xf32> to vector<8x512xbf16>
    %c0_12 = arith.constant 0 : index
    %c0_13 = arith.constant 0 : index
    %18 = vector.load %arg6[%c0_12, %c0_13] : memref<512x512xbf16, #tpu.memory_space<vmem>>, vector<512x512xbf16>
    %cst_14 = arith.constant dense<0.000000e+00> : vector<8x512xf32>
    %19 = tpu.matmul %17, %18, %cst_14 {dimension_numbers = #tpu.dot_dimension_numbers<[1], [0], [0], [1], [0, 0, 1, 1], [], []>} : vector<8x512xbf16>, vector<512x512xbf16>, vector<8x512xf32> -> vector<8x512xf32>
    %c0_15 = arith.constant 0 : index
    %c0_16 = arith.constant 0 : index
    %20 = vector.load %arg7[%c0_15, %c0_16] : memref<1x512xf32, #tpu.memory_space<vmem>>, vector<1x512xf32>
    %21 = vector.broadcast %20 : vector<1x512xf32> to vector<8x512xf32>
    %22 = arith.addf %19, %21 : vector<8x512xf32>
    %cst_17 = arith.constant 0.000000e+00 : f32
    %23 = vector.broadcast %cst_17 : f32 to vector<8x512xf32>
    %24 = arith.maximumf %22, %23 : vector<8x512xf32>
    %25 = arith.truncf %24 : vector<8x512xf32> to vector<8x512xbf16>
    %c0_18 = arith.constant 0 : index
    %c0_19 = arith.constant 0 : index
    %26 = vector.load %arg8[%c0_18, %c0_19] : memref<512x128xbf16, #tpu.memory_space<vmem>>, vector<512x128xbf16>
    %cst_20 = arith.constant dense<0.000000e+00> : vector<8x128xf32>
    %27 = tpu.matmul %25, %26, %cst_20 {dimension_numbers = #tpu.dot_dimension_numbers<[1], [0], [0], [1], [0, 0, 1, 1], [], []>} : vector<8x512xbf16>, vector<512x128xbf16>, vector<8x128xf32> -> vector<8x128xf32>
    %c0_21 = arith.constant 0 : index
    %c0_22 = arith.constant 0 : index
    %28 = vector.load %arg9[%c0_21, %c0_22] : memref<1x128xf32, #tpu.memory_space<vmem>>, vector<1x128xf32>
    %29 = vector.broadcast %28 : vector<1x128xf32> to vector<8x128xf32>
    %30 = arith.addf %27, %29 : vector<8x128xf32>
    %c0_23 = arith.constant 0 : index
    %c0_24 = arith.constant 0 : index
    %31 = vector.load %arg10[%c0_23, %c0_24] : memref<8x128xf32, #tpu.memory_space<vmem>>, vector<8x128xf32>
    tpu.vector_store %arg10[%c0_23, %c0_24], %30 {strides = array<i32>} : memref<8x128xf32, #tpu.memory_space<vmem>>, vector<8x128xf32>,
    return
  }
  func.func @transform_0(%arg0: i32) -> (i32, i32) {
    %c0_i32 = arith.constant 0 : i32
    %c0_i32_0 = arith.constant 0 : i32
    return %arg0, %c0_i32 : i32, i32
  }
  func.func @transform_1(%arg0: i32) -> (i32, i32) {
    %c0_i32 = arith.constant 0 : i32
    %c0_i32_0 = arith.constant 0 : i32
    %c0_i32_1 = arith.constant 0 : i32
    return %c0_i32, %c0_i32_0 : i32, i32
  }
  func.func @transform_2(%arg0: i32) -> (i32, i32) {
    %c0_i32 = arith.constant 0 : i32
    %c0_i32_0 = arith.constant 0 : i32
    %c0_i32_1 = arith.constant 0 : i32
    return %c0_i32, %c0_i32_0 : i32, i32
  }
  func.func @transform_3(%arg0: i32) -> (i32, i32) {
    %c0_i32 = arith.constant 0 : i32
    %c0_i32_0 = arith.constant 0 : i32
    %c0_i32_1 = arith.constant 0 : i32
    return %c0_i32, %c0_i32_0 : i32, i32
  }
  func.func @transform_4(%arg0: i32) -> (i32, i32) {
    %c0_i32 = arith.constant 0 : i32
    %c0_i32_0 = arith.constant 0 : i32
    %c0_i32_1 = arith.constant 0 : i32
    return %c0_i32, %c0_i32_0 : i32, i32
  }
  func.func @transform_5(%arg0: i32) -> (i32, i32) {
    %c0_i32 = arith.constant 0 : i32
    %c0_i32_0 = arith.constant 0 : i32
    %c0_i32_1 = arith.constant 0 : i32
    return %c0_i32, %c0_i32_0 : i32, i32
  }
  func.func @transform_6(%arg0: i32) -> (i32, i32) {
    %c0_i32 = arith.constant 0 : i32
    %c0_i32_0 = arith.constant 0 : i32
    %c0_i32_1 = arith.constant 0 : i32
    return %c0_i32, %c0_i32_0 : i32, i32
  }
  func.func @transform_7(%arg0: i32) -> (i32, i32) {
    %c0_i32 = arith.constant 0 : i32
    %c0_i32_0 = arith.constant 0 : i32
    %c0_i32_1 = arith.constant 0 : i32
    return %c0_i32, %c0_i32_0 : i32, i32
  }
  func.func @transform_8(%arg0: i32) -> (i32, i32) {
    %c0_i32 = arith.constant 0 : i32
    %c0_i32_0 = arith.constant 0 : i32
    %c0_i32_1 = arith.constant 0 : i32
    return %c0_i32, %c0_i32_0 : i32, i32
  }
  func.func @transform_9(%arg0: i32) -> (i32, i32) {
    %c0_i32 = arith.constant 0 : i32
    %c0_i32_0 = arith.constant 0 : i32
    return %arg0, %c0_i32 : i32, i32
  }
}

</mosaic_0001>

<bundles_post_ra>
// kernel: tpu_custom_call.1
= control target key start
LH: loop header
LB: loop body
LE: loop exit
PB: predicated region body
PF: predicated region fallthrough
CT: control target
= control target key end

     0   :  { %14 = vsyncpa [#allocation3], 0  ;;  %s2957_s0 = inlined_call_operand.hbm [shape: f32[8,32], index: 0, kind: input, shape index: {}]   ;;  %s2958_s1 = inlined_call_operand.hbm [shape: bf16[32,256], index: 1, kind: input, shape index: {}]   ;;  %s2959_s2 = inlined_call_operand.vmem [shape: f32[1,256], index: 2, kind: input, shape index: {}]   ;;  %s2960_s3 = inlined_call_operand.hbm [shape: bf16[256,512], index: 3, kind: input, shape index: {}]   ;;  %s2961_s4 = inlined_call_operand.vmem [shape: f32[1,512], index: 4, kind: input, shape index: {}]   ;;  %s2962_s5 = inlined_call_operand.hbm [shape: bf16[512,512], index: 5, kind: input, shape index: {}]   ;;  %s2963_s6 = inlined_call_operand.vmem [shape: f32[1,512], index: 6, kind: input, shape index: {}]   ;;  %s2964_s7 = inlined_call_operand.hbm [shape: bf16[512,128], index: 7, kind: input, shape index: {}]   ;;  %s2965_s8 = inlined_call_operand.vmem [shape: f32[1,128], index: 8, kind: input, shape index: {}]   ;;  %s2966_s9 = inlined_call_operand.hbm [shape: f32[8,128], index: 9, kind: output, shape index: {}]  }
   0x1   :  { %15 = vsyncpa [#allocation6], 0 }
   0x2   :  { %16 = vsyncpa [#allocation9], 0 }
   0x3   :  { %17 = vsyncpa [#allocation4], 0  ;;  %s2771_s30 = smov [#allocation5]   ;;  %s2631_s13 = scalar_lea.hbm %s2958_s1, 512 }
   0x4   :  { %s33_s10 = sshll.u32 %s2771_s30, 4  ;;  %p2632_p0 = scmp.ne.s32.totalorder %s2958_s1, %s2631_s13  ;;  %s34_s10 = int_to_ptr.vmem [resolvable:$true] %s33_s10 }
   0x5   :  { %p2635_p1 = scmp.lt.u32.totalorder %s2631_s13, %s2958_s1 }
   0x7   :  { %p2637_p2 = pnand %p2635_p1, %p2632_p0 }
   0x9   :  { %2640 = shalt.err (!%p2637_p2)
}
   0xa   :  { %s2641_s18 = scalar_lea.vmem %s34_s10, 512  ;;  %p2646_p4 = scmp.lt.s32.totalorder %s34_s10, %s34_s10 }
   0xb   :  { %p2642_p3 = scmp.ne.s32.totalorder %s34_s10, %s2641_s18  ;;  %p2647_p5 = scmp.lt.s32.totalorder %s2641_s18, %s2641_s18 }
   0xd   :  { %p2648_p6 = por %p2647_p5, %p2646_p4 }
   0xf   :  { %p2649_p7 = pnand %p2648_p6, %p2642_p3 }
  0x11   :  { %2652 = shalt.err (!%p2649_p7)
}
  0x12   :  { %s2772_s19 = smov 128   ;;  %s2773_s20 = smov 8  }
  0x13   :  { %39 = dma.hbm_to_vmem [thread:$0]  %s2958_s1, 512, %s34_s10, [#allocation6], %s2772_s19, %s2772_s19, %s2773_s20  }
  0x14   :  { %s2774_s23 = smov [#allocation8]   ;;  %s2775_s25 = smov [#allocation2]  }
  0x15   :  { %s61_s24 = sshll.u32 %s2774_s23, 4  ;;  %s24_s26 = sshll.u32 %s2775_s25, 4  ;;  %s62_s24 = int_to_ptr.vmem [resolvable:$true] %s61_s24  ;;  %s25_s26 = int_to_ptr.vmem [resolvable:$true] %s24_s26 }
  0x16   :  { %s2653_s29 = scalar_lea.hbm %s2962_s5, 16384 }
  0x17   :  { %p2654_p8 = scmp.ne.s32.totalorder %s2962_s5, %s2653_s29  ;;  %p2657_p9 = scmp.lt.u32.totalorder %s2653_s29, %s2962_s5 }
  0x19   :  { %p2659_p10 = pnand %p2657_p9, %p2654_p8 }
  0x1b   :  { %2662 = shalt.err (!%p2659_p10)
}
  0x1c   :  { %s2663_s1 = scalar_lea.vmem %s62_s24, 16384  ;;  %p2668_p12 = scmp.lt.s32.totalorder %s62_s24, %s62_s24 }
  0x1d   :  { %p2664_p11 = scmp.ne.s32.totalorder %s62_s24, %s2663_s1  ;;  %p2669_p13 = scmp.lt.s32.totalorder %s2663_s1, %s2663_s1 }
  0x1f   :  { %p2670_p0 = por %p2669_p13, %p2668_p12 }
  0x21   :  { %p2671_p1 = pnand %p2670_p0, %p2664_p11 }
  0x23   :  { %2674 = shalt.err (!%p2671_p1)
}
  0x24   :  { %s2776_s10 = smov 256   ;;  %s2777_s14 = smov 16  }
  0x25   :  { %67 = dma.hbm_to_vmem [thread:$0]  %s2962_s5, 16384, %s62_s24, [#allocation9], %s2776_s10, %s2776_s10, %s2777_s14  }
  0x26   :  { %s2675_s19 = scalar_lea.hbm %s2957_s0, 128 }
  0x27   :  { %p2676_p2 = scmp.ne.s32.totalorder %s2957_s0, %s2675_s19  ;;  %p2679_p3 = scmp.lt.u32.totalorder %s2675_s19, %s2957_s0 }
  0x29   :  { %p2681_p4 = pnand %p2679_p3, %p2676_p2 }
  0x2b   :  { %2684 = shalt.err (!%p2681_p4)
}
  0x2c   :  { %s2685_s25 = scalar_lea.vmem %s25_s26, 128  ;;  %p2690_p6 = scmp.lt.s32.totalorder %s25_s26, %s25_s26 }
  0x2d   :  { %p2686_p5 = scmp.ne.s32.totalorder %s25_s26, %s2685_s25  ;;  %p2691_p7 = scmp.lt.s32.totalorder %s2685_s25, %s2685_s25 }
  0x2f   :  { %p2692_p8 = por %p2691_p7, %p2690_p6 }
  0x31   :  { %p2693_p9 = pnand %p2692_p8, %p2686_p5 }
  0x33   :  { %2696 = shalt.err (!%p2693_p9)
}
  0x34   :  { %27 = dma.hbm_to_vmem [thread:$0]  %s2957_s0, 128, %s25_s26, [#allocation3]  }
  0x35   :  { %s2778_s27 = smov [#allocation7]   ;;  %s2779_s29 = smov [#allocation10]  }
  0x36   :  { %s47_s28 = sshll.u32 %s2778_s27, 4  ;;  %s75_s30 = sshll.u32 %s2779_s29, 4  ;;  %s48_s28 = int_to_ptr.vmem [resolvable:$true] %s47_s28  ;;  %s76_s30 = int_to_ptr.vmem [resolvable:$true] %s75_s30 }
  0x37   :  { %s2697_s13 = scalar_lea.hbm %s2960_s3, 8192 }
  0x38   :  { %p2698_p10 = scmp.ne.s32.totalorder %s2960_s3, %s2697_s13  ;;  %p2701_p11 = scmp.lt.u32.totalorder %s2697_s13, %s2960_s3 }
  0x3a   :  { %p2703_p12 = pnand %p2701_p11, %p2698_p10 }
  0x3c   :  { %2706 = shalt.err (!%p2703_p12)
}
  0x3d   :  { %s2707_s0 = scalar_lea.vmem %s48_s28, 8192  ;;  %p2712_p0 = scmp.lt.s32.totalorder %s48_s28, %s48_s28 }
  0x3e   :  { %p2708_p13 = scmp.ne.s32.totalorder %s48_s28, %s2707_s0  ;;  %p2713_p1 = scmp.lt.s32.totalorder %s2707_s0, %s2707_s0 }
  0x40   :  { %p2714_p2 = por %p2713_p1, %p2712_p0 }
  0x42   :  { %p2715_p3 = pnand %p2714_p2, %p2708_p13 }
  0x44   :  { %2718 = shalt.err (!%p2715_p3)
}
  0x45   :  { %53 = dma.hbm_to_vmem [thread:$0]  %s2960_s3, 8192, %s48_s28, [#allocation6], %s2776_s10, %s2776_s10, %s2777_s14  }
  0x46   :  { %s2719_s21 = scalar_lea.hbm %s2964_s7, 4096 }
  0x47   :  { %p2720_p4 = scmp.ne.s32.totalorder %s2964_s7, %s2719_s21  ;;  %p2723_p5 = scmp.lt.u32.totalorder %s2719_s21, %s2964_s7 }
  0x49   :  { %p2725_p6 = pnand %p2723_p5, %p2720_p4 }
  0x4b   :  { %2728 = shalt.err (!%p2725_p6)
}
  0x4c   :  { %s2729_s24 = scalar_lea.vmem %s76_s30, 4096  ;;  %p2734_p8 = scmp.lt.s32.totalorder %s76_s30, %s76_s30 }
  0x4d   :  { %p2730_p7 = scmp.ne.s32.totalorder %s76_s30, %s2729_s24  ;;  %p2735_p9 = scmp.lt.s32.totalorder %s2729_s24, %s2729_s24 }
  0x4f   :  { %p2736_p10 = por %p2735_p9, %p2734_p8 }
  0x51   :  { %p2737_p11 = pnand %p2736_p10, %p2730_p7 }
  0x53   :  { %2740 = shalt.err (!%p2737_p11)
}
  0x54   :  { %s2780_s3 = smov 64   ;;  %s2781_s10 = smov 4  }
  0x55   :  { %81 = dma.hbm_to_vmem [thread:$0]  %s2964_s7, 4096, %s76_s30, [#allocation9], %s2780_s3, %s2780_s3, %s2781_s10  }
  0x56   :  { %2763 = dma.done.wait [#allocation3], 128  }
  0x57   :  { %2764 = vsyncadd [#allocation3], 4294967168 }
  0x58   :  { %2765 = dma.done.wait [#allocation6], 8704  }
  0x59   :  { %2766 = vsyncadd [#allocation6], 4294958592 }
  0x5a   :  { %2767 = dma.done.wait [#allocation9], 20480  }
  0x5b   :  { %2768 = vsyncadd [#allocation9], 4294946816  ;;  %v2782_v0 = vmov 0   ;;  %v2305_v1 = vld [vmem:[#allocation5 + $0x4] ss:$8 sps:$4 sm:$0xff]   ;;  %v100_v5 = vld [vmem:[#allocation2] sm:$0xff] }
  0x5c   :  { %174 = vmatprep.mubr.bf16.mxu0 %v2782_v0  ;;  %v2307_v2 = vld [vmem:[#allocation5] ss:$8 sps:$4 sm:$0xff]   ;;  %142 = vmatprep.subr.bf16.mxu0 %v2305_v1  ;;  %v2308_v3 = vld [vmem:[#allocation5 + $0x14] ss:$8 sps:$4 sm:$0xff]   ;;  %v2310_v4 = vld [vmem:[#allocation5 + $0x10] ss:$8 sps:$4 sm:$0xff]   ;;  %v101_v9 = vpack.c.bf16 %v100_v5, %v100_v5 }
  0x5d   :  { %143 = vmatpush1.bf16.msra.mxu0 %v2307_v2  ;;  %v2311_v6 = vld [vmem:[#allocation7 + $0x4] ss:$16 sps:$4 sm:$0xff]   ;;  %v2315_v7 = vld [vmem:[#allocation7 + $0xc] ss:$16 sps:$4 sm:$0xff]   ;;  %v2316_v8 = vld [vmem:[#allocation7] ss:$16 sps:$4 sm:$0xff]  }
  0x5e   :  { %144 = vmatprep.subr.bf16.mxu0 %v2308_v3  ;;  %593 = vmatprep.subr.bf16.mxu1 %v2311_v6  ;;  %v2317_v10 = vld [vmem:[#allocation7 + $0x24] ss:$16 sps:$4 sm:$0xff]   ;;  %vm138_vm0 = vcmask 261120   ;;  %v2313_v11 = vld [vmem:[#allocation7 + $0x8] ss:$16 sps:$4 sm:$0xff]   ;;  %s2783_s12 = smov [#allocation11]  }
  0x5f   :  { %594 = vmatpush1.bf16.msra.mxu1 %v2316_v8  ;;  %v2321_v12 = vld [vmem:[#allocation7 + $0x2c] ss:$16 sps:$4 sm:$0xff]   ;;  %v2322_v13 = vld [vmem:[#allocation7 + $0x20] ss:$16 sps:$4 sm:$0xff]   ;;  %v2323_v14 = vld [vmem:[#allocation7 + $0x44] ss:$16 sps:$4 sm:$0xff]  }
  0x60   :  { %595 = vmatprep.subr.bf16.mxu1 %v2317_v10  ;;  %v2319_v15 = vld [vmem:[#allocation7 + $0x28] ss:$16 sps:$4 sm:$0xff]   ;;  %v2327_v16 = vld [vmem:[#allocation7 + $0x4c] ss:$16 sps:$4 sm:$0xff]   ;;  %v2328_v17 = vld [vmem:[#allocation7 + $0x40] ss:$16 sps:$4 sm:$0xff]  }
  0x61   :  { %145 = vmatpush1.bf16.msra.mxu0 %v2310_v4  ;;  %v2329_v18 = vld [vmem:[#allocation7 + $0x64] ss:$16 sps:$4 sm:$0xff]   ;;  %v2325_v19 = vld [vmem:[#allocation7 + $0x48] ss:$16 sps:$4 sm:$0xff]   ;;  %v2333_v20 = vld [vmem:[#allocation7 + $0x6c] ss:$16 sps:$4 sm:$0xff]  }
  0x62   :  { %634 = vmatprep.subr.bf16.mxu0 %v2315_v7  ;;  %v2334_v21 = vld [vmem:[#allocation7 + $0x60] ss:$16 sps:$4 sm:$0xff]   ;;  %v2335_v22 = vld [vmem:[#allocation7 + $0x84] ss:$16 sps:$4 sm:$0xff]   ;;  %v2331_v23 = vld [vmem:[#allocation7 + $0x68] ss:$16 sps:$4 sm:$0xff]  }
  0x63   :  { %596 = vmatpush1.bf16.msra.mxu1 %v2322_v13  ;;  %v2339_v24 = vld [vmem:[#allocation7 + $0x8c] ss:$16 sps:$4 sm:$0xff]   ;;  %v2340_v25 = vld [vmem:[#allocation7 + $0x80] ss:$16 sps:$4 sm:$0xff]   ;;  %v2341_v26 = vld [vmem:[#allocation7 + $0xa4] ss:$16 sps:$4 sm:$0xff]  }
  0x64   :  { %2010 = vmatmul.mubr.msk.bf16.vlgmr.msra.gmra.mrb[0].mxu0 %vm138_vm0, %v101_v9  ;;  %597 = vmatprep.subr.bf16.mxu1 %v2323_v14  ;;  %v2337_v27 = vld [vmem:[#allocation7 + $0x88] ss:$16 sps:$4 sm:$0xff]   ;;  %v2345_v28 = vld [vmem:[#allocation7 + $0xac] ss:$16 sps:$4 sm:$0xff]   ;;  %v2346_v29 = vld [vmem:[#allocation7 + $0xa0] ss:$16 sps:$4 sm:$0xff]   ;;  %v108_v9 = vlaneseq }
  0x65   :  { %635 = vmatpush1.bf16.msra.mxu0 %v2313_v11  ;;  %v2347_v30 = vld [vmem:[#allocation7 + $0xc4] ss:$16 sps:$4 sm:$0xff]   ;;  %v2343_v31 = vld [vmem:[#allocation7 + $0xa8] ss:$16 sps:$4 sm:$0xff]   ;;  %v2351_v32 = vld [vmem:[#allocation7 + $0xcc] ss:$16 sps:$4 sm:$0xff]  }
  0x66   :  { %636 = vmatprep.subr.bf16.mxu0 %v2321_v12  ;;  %v2352_v33 = vld [vmem:[#allocation7 + $0xc0] ss:$16 sps:$4 sm:$0xff]   ;;  %v2353_v34 = vld [vmem:[#allocation7 + $0xe4] ss:$16 sps:$4 sm:$0xff]   ;;  %v2349_v35 = vld [vmem:[#allocation7 + $0xc8] ss:$16 sps:$4 sm:$0xff]  }
  0x67   :  { %598 = vmatpush1.bf16.msra.mxu1 %v2328_v17  ;;  %v2357_v36 = vld [vmem:[#allocation7 + $0xec] ss:$16 sps:$4 sm:$0xff]   ;;  %v2358_v37 = vld [vmem:[#allocation7 + $0xe0] ss:$16 sps:$4 sm:$0xff]   ;;  %v2359_v38 = vld [vmem:[#allocation7 + $0x104] ss:$16 sps:$4 sm:$0xff]  }
  0x68   :  { %599 = vmatprep.subr.bf16.mxu1 %v2329_v18  ;;  %v2355_v39 = vld [vmem:[#allocation7 + $0xe8] ss:$16 sps:$4 sm:$0xff]   ;;  %v2363_v40 = vld [vmem:[#allocation7 + $0x10c] ss:$16 sps:$4 sm:$0xff]   ;;  %v2364_v41 = vld [vmem:[#allocation7 + $0x100] ss:$16 sps:$4 sm:$0xff]  }
  0x69   :  { %637 = vmatpush1.bf16.msra.mxu0 %v2319_v15  ;;  %v2365_v42 = vld [vmem:[#allocation7 + $0x124] ss:$16 sps:$4 sm:$0xff]   ;;  %v2361_v43 = vld [vmem:[#allocation7 + $0x108] ss:$16 sps:$4 sm:$0xff]   ;;  %v2370_v44 = vld [vmem:[#allocation7 + $0x120] ss:$16 sps:$4 sm:$0xff]  }
  0x6a   :  { %638 = vmatprep.subr.bf16.mxu0 %v2327_v16  ;;  %v2369_v45 = vld [vmem:[#allocation7 + $0x12c] ss:$16 sps:$4 sm:$0xff]   ;;  %v2371_v46 = vld [vmem:[#allocation7 + $0x144] ss:$16 sps:$4 sm:$0xff]   ;;  %v2367_v47 = vld [vmem:[#allocation7 + $0x128] ss:$16 sps:$4 sm:$0xff]  }
  0x6b   :  { %600 = vmatpush1.bf16.msra.mxu1 %v2334_v21  ;;  %v2376_v48 = vld [vmem:[#allocation7 + $0x140] ss:$16 sps:$4 sm:$0xff]   ;;  %v2375_v49 = vld [vmem:[#allocation7 + $0x14c] ss:$16 sps:$4 sm:$0xff]   ;;  %v2377_v50 = vld [vmem:[#allocation7 + $0x164] ss:$16 sps:$4 sm:$0xff]  }
  0x6c   :  { %601 = vmatprep.subr.bf16.mxu1 %v2335_v22  ;;  %v2373_v51 = vld [vmem:[#allocation7 + $0x148] ss:$16 sps:$4 sm:$0xff]   ;;  %v2382_v52 = vld [vmem:[#allocation7 + $0x160] ss:$16 sps:$4 sm:$0xff]   ;;  %v2381_v53 = vld [vmem:[#allocation7 + $0x16c] ss:$16 sps:$4 sm:$0xff]  }
  0x6d   :  { %639 = vmatpush1.bf16.msra.mxu0 %v2325_v19  ;;  %v2383_v54 = vld [vmem:[#allocation7 + $0x184] ss:$16 sps:$4 sm:$0xff]   ;;  %v2379_v55 = vld [vmem:[#allocation7 + $0x168] ss:$16 sps:$4 sm:$0xff]   ;;  %v2388_v56 = vld [vmem:[#allocation7 + $0x180] ss:$16 sps:$4 sm:$0xff]  }
  0x6e   :  { %640 = vmatprep.subr.bf16.mxu0 %v2333_v20  ;;  %v2387_v57 = vld [vmem:[#allocation7 + $0x18c] ss:$16 sps:$4 sm:$0xff]   ;;  %v2389_v58 = vld [vmem:[#allocation7 + $0x1a4] ss:$16 sps:$4 sm:$0xff]   ;;  %v2385_v59 = vld [vmem:[#allocation7 + $0x188] ss:$16 sps:$4 sm:$0xff]  }
  0x6f   :  { %602 = vmatpush1.bf16.msra.mxu1 %v2340_v25  ;;  %v2394_v60 = vld [vmem:[#allocation7 + $0x1a0] ss:$16 sps:$4 sm:$0xff]   ;;  %v2393_v61 = vld [vmem:[#allocation7 + $0x1ac] ss:$16 sps:$4 sm:$0xff]   ;;  %v2391_v62 = vld [vmem:[#allocation7 + $0x1a8] ss:$16 sps:$4 sm:$0xff]  }
  0x70   :  { %603 = vmatprep.subr.bf16.mxu1 %v2341_v26  ;;  %v2395_v63 = vld [vmem:[#allocation7 + $0x1c4] ss:$16 sps:$4 sm:$0xff]   ;;  %v2399_v0 = vld [vmem:[#allocation7 + $0x1cc] ss:$16 sps:$4 sm:$0xff]   ;;  %v2397_v1 = vld [vmem:[#allocation7 + $0x1c8] ss:$16 sps:$4 sm:$0xff]  }
  0x71   :  { %641 = vmatpush1.bf16.msra.mxu0 %v2331_v23  ;;  %v2400_v2 = vld [vmem:[#allocation7 + $0x1c0] ss:$16 sps:$4 sm:$0xff]   ;;  %v2401_v3 = vld [vmem:[#allocation7 + $0x1e4] ss:$16 sps:$4 sm:$0xff]   ;;  %v2405_v4 = vld [vmem:[#allocation7 + $0x1ec] ss:$16 sps:$4 sm:$0xff]  }
  0x72   :  { %642 = vmatprep.subr.bf16.mxu0 %v2339_v24  ;;  %v2403_v5 = vld [vmem:[#allocation7 + $0x1e8] ss:$16 sps:$4 sm:$0xff]   ;;  %v2406_v6 = vld [vmem:[#allocation7 + $0x1e0] ss:$16 sps:$4 sm:$0xff]   ;;  %v2409_v7 = vld [vmem:[#allocation8 + $0x4] ss:$16 sps:$4 sm:$0xff]  }
  0x73   :  { %604 = vmatpush1.bf16.msra.mxu1 %v2346_v29  ;;  %v2412_v8 = vld [vmem:[#allocation8 + $0xc] ss:$16 sps:$4 sm:$0xff]   ;;  %v2900_v10 = vshrl.u32 %v108_v9, 7  ;;  %v106_v12 = vld [vmem:[%s2959_s2] sm:$0x3]  ;;  %s1995_s13 = sshll.u32 %s2783_s12, 4  ;;  %s1996_s13 = int_to_ptr.vmem [resolvable:$true] %s1995_s13 }
  0x74   :  { %605 = vmatprep.subr.bf16.mxu1 %v2347_v30  ;;  %v2407_v25 = vld [vmem:[#allocation8] ss:$16 sps:$4 sm:$0xff]   ;;  %v2410_v26 = vld [vmem:[#allocation8 + $0x8] ss:$16 sps:$4 sm:$0xff]   ;;  %v2418_v29 = vld [vmem:[#allocation8 + $0x2c] ss:$16 sps:$4 sm:$0xff]   ;;  %p2746_p13 = scmp.lt.s32.totalorder %s1996_s13, %s1996_s13 }
  0x75   :  { %643 = vmatpush1.bf16.msra.mxu0 %v2337_v27  ;;  %v2903_v11 = vsub.s32 0, %v2900_v10  ;;  %v2909_v13 = vsub.s32 1, %v2900_v10  ;;  %v2413_v30 = vld [vmem:[#allocation8 + $0x20] ss:$16 sps:$4 sm:$0xff]   ;;  %v2484_v9 = vld [vmem:[#allocation8 + $0x18c] ss:$16 sps:$4 sm:$0xff]  }
  0x76   :  { %644 = vmatprep.subr.bf16.mxu0 %v2345_v28  ;;  %v2415_v28 = vld [vmem:[#allocation8 + $0x24] ss:$16 sps:$4 sm:$0xff]   ;;  %s2741_s1 = scalar_lea.vmem %s1996_s13, 128 }
  0x77   :  { %606 = vmatpush1.bf16.msra.mxu1 %v2352_v33  ;;  %v111_v14 = vrot.slane %v106_v12, %v2903_v11  ;;  %v115_v15 = vrot.slane %v106_v12, %v2909_v13  ;;  %v2424_v33 = vld [vmem:[#allocation8 + $0x4c] ss:$16 sps:$4 sm:$0xff]   ;;  %v2479_v12 = vld [vmem:[#allocation8 + $0x180] ss:$16 sps:$4 sm:$0xff]   ;;  %p2742_p12 = scmp.ne.s32.totalorder %s1996_s13, %s2741_s1  ;;  %p2747_p0 = scmp.lt.s32.totalorder %s2741_s1, %s2741_s1 }
  0x78   :  { %607 = vmatprep.subr.bf16.mxu1 %v2353_v34  ;;  %v2419_v34 = vld [vmem:[#allocation8 + $0x40] ss:$16 sps:$4 sm:$0xff]  }
  0x79   :  { %645 = vmatpush1.bf16.msra.mxu0 %v2343_v31  ;;  %v2416_v31 = vld [vmem:[#allocation8 + $0x28] ss:$16 sps:$4 sm:$0xff]   ;;  %p2748_p1 = por %p2747_p0, %p2746_p13 }
  0x7a   :  { %646 = vmatprep.subr.bf16.mxu0 %v2351_v32  ;;  %v2421_v32 = vld [vmem:[#allocation8 + $0x44] ss:$16 sps:$4 sm:$0xff]  }
  0x7b   :  { %608 = vmatpush1.bf16.msra.mxu1 %v2358_v37  ;;  %v2430_v37 = vld [vmem:[#allocation8 + $0x6c] ss:$16 sps:$4 sm:$0xff]   ;;  %p2749_p2 = pnand %p2748_p1, %p2742_p12 }
  0x7c   :  { %609 = vmatprep.subr.bf16.mxu1 %v2359_v38  ;;  %v2425_v38 = vld [vmem:[#allocation8 + $0x60] ss:$16 sps:$4 sm:$0xff]  }
  0x7d   :  { %647 = vmatpush1.bf16.msra.mxu0 %v2349_v35  ;;  %v2422_v35 = vld [vmem:[#allocation8 + $0x48] ss:$16 sps:$4 sm:$0xff]  }
  0x7e   :  { %648 = vmatprep.subr.bf16.mxu0 %v2357_v36  ;;  %v2427_v36 = vld [vmem:[#allocation8 + $0x64] ss:$16 sps:$4 sm:$0xff]  }
  0x7f   :  { %610 = vmatpush1.bf16.msra.mxu1 %v2364_v41  ;;  %v2436_v41 = vld [vmem:[#allocation8 + $0x8c] ss:$16 sps:$4 sm:$0xff]  }
  0x80   :  { %611 = vmatprep.subr.bf16.mxu1 %v2365_v42  ;;  %v2431_v42 = vld [vmem:[#allocation8 + $0x80] ss:$16 sps:$4 sm:$0xff]  }
  0x81   :  { %649 = vmatpush1.bf16.msra.mxu0 %v2355_v39  ;;  %v2428_v39 = vld [vmem:[#allocation8 + $0x68] ss:$16 sps:$4 sm:$0xff]  }
  0x82   :  { %650 = vmatprep.subr.bf16.mxu0 %v2363_v40  ;;  %v2433_v40 = vld [vmem:[#allocation8 + $0x84] ss:$16 sps:$4 sm:$0xff]  }
  0x83   :  { %612 = vmatpush1.bf16.msra.mxu1 %v2370_v44  ;;  %v2439_v44 = vld [vmem:[#allocation8 + $0xa4] ss:$16 sps:$4 sm:$0xff]  }
  0x84   :  { %613 = vmatprep.subr.bf16.mxu1 %v2371_v46  ;;  %v2437_v46 = vld [vmem:[#allocation8 + $0xa0] ss:$16 sps:$4 sm:$0xff]  }
  0x85   :  { %651 = vmatpush1.bf16.msra.mxu0 %v2361_v43  ;;  %v2434_v43 = vld [vmem:[#allocation8 + $0x88] ss:$16 sps:$4 sm:$0xff]  }
  0x86   :  { %652 = vmatprep.subr.bf16.mxu0 %v2369_v45  ;;  %v2442_v45 = vld [vmem:[#allocation8 + $0xac] ss:$16 sps:$4 sm:$0xff]  }
  0x87   :  { %614 = vmatpush1.bf16.msra.mxu1 %v2376_v48  ;;  %v2445_v48 = vld [vmem:[#allocation8 + $0xc4] ss:$16 sps:$4 sm:$0xff]  }
  0x88   :  { %615 = vmatprep.subr.bf16.mxu1 %v2377_v50  ;;  %v2443_v50 = vld [vmem:[#allocation8 + $0xc0] ss:$16 sps:$4 sm:$0xff]  }
  0x89   :  { %653 = vmatpush1.bf16.msra.mxu0 %v2367_v47  ;;  %v2440_v47 = vld [vmem:[#allocation8 + $0xa8] ss:$16 sps:$4 sm:$0xff]  }
  0x8a   :  { %654 = vmatprep.subr.bf16.mxu0 %v2375_v49  ;;  %v2448_v49 = vld [vmem:[#allocation8 + $0xcc] ss:$16 sps:$4 sm:$0xff]  }
  0x8b   :  { %616 = vmatpush1.bf16.msra.mxu1 %v2382_v52  ;;  %v2451_v52 = vld [vmem:[#allocation8 + $0xe4] ss:$16 sps:$4 sm:$0xff]  }
  0x8c   :  { %617 = vmatprep.subr.bf16.mxu1 %v2383_v54  ;;  %v2449_v54 = vld [vmem:[#allocation8 + $0xe0] ss:$16 sps:$4 sm:$0xff]  }
  0x8d   :  { %655 = vmatpush1.bf16.msra.mxu0 %v2373_v51  ;;  %v2446_v51 = vld [vmem:[#allocation8 + $0xc8] ss:$16 sps:$4 sm:$0xff]  }
  0x8e   :  { %656 = vmatprep.subr.bf16.mxu0 %v2381_v53  ;;  %v2454_v53 = vld [vmem:[#allocation8 + $0xec] ss:$16 sps:$4 sm:$0xff]  }
  0x8f   :  { %618 = vmatpush1.bf16.msra.mxu1 %v2388_v56  ;;  %v2457_v56 = vld [vmem:[#allocation8 + $0x104] ss:$16 sps:$4 sm:$0xff]  }
  0x90   :  { %619 = vmatprep.subr.bf16.mxu1 %v2389_v58  ;;  %v2455_v58 = vld [vmem:[#allocation8 + $0x100] ss:$16 sps:$4 sm:$0xff]  }
  0x91   :  { %657 = vmatpush1.bf16.msra.mxu0 %v2379_v55  ;;  %v2452_v55 = vld [vmem:[#allocation8 + $0xe8] ss:$16 sps:$4 sm:$0xff]  }
  0x92   :  { %658 = vmatprep.subr.bf16.mxu0 %v2387_v57  ;;  %v2460_v57 = vld [vmem:[#allocation8 + $0x10c] ss:$16 sps:$4 sm:$0xff]  }
  0x93   :  { %620 = vmatpush1.bf16.msra.mxu1 %v2394_v60  ;;  %v2463_v60 = vld [vmem:[#allocation8 + $0x124] ss:$16 sps:$4 sm:$0xff]  }
  0x94   :  { %621 = vmatprep.subr.bf16.mxu1 %v2395_v63  ;;  %v2464_v63 = vld [vmem:[#allocation8 + $0x128] ss:$16 sps:$4 sm:$0xff]  }
  0x95   :  { %659 = vmatpush1.bf16.msra.mxu0 %v2385_v59  ;;  %v2458_v59 = vld [vmem:[#allocation8 + $0x108] ss:$16 sps:$4 sm:$0xff]  }
  0x96   :  { %660 = vmatprep.subr.bf16.mxu0 %v2393_v61  ;;  %v2466_v61 = vld [vmem:[#allocation8 + $0x12c] ss:$16 sps:$4 sm:$0xff]  }
  0x97   :  { %622 = vmatpush1.bf16.msra.mxu1 %v2400_v2  ;;  %v2467_v2 = vld [vmem:[#allocation8 + $0x140] ss:$16 sps:$4 sm:$0xff]  }
  0x98   :  { %623 = vmatprep.subr.bf16.mxu1 %v2401_v3  ;;  %v2470_v3 = vld [vmem:[#allocation8 + $0x148] ss:$16 sps:$4 sm:$0xff]  }
  0x99   :  { %661 = vmatpush1.bf16.msra.mxu0 %v2391_v62  ;;  %v2461_v62 = vld [vmem:[#allocation8 + $0x120] ss:$16 sps:$4 sm:$0xff]  }
  0x9a   :  { %662 = vmatprep.subr.bf16.mxu0 %v2399_v0  ;;  %v2469_v0 = vld [vmem:[#allocation8 + $0x144] ss:$16 sps:$4 sm:$0xff]  }
  0x9b   :  { %624 = vmatpush1.bf16.msra.mxu1 %v2406_v6  ;;  %v2473_v6 = vld [vmem:[#allocation8 + $0x160] ss:$16 sps:$4 sm:$0xff]  }
  0x9c   :  { %1473 = vmatprep.subr.bf16.mxu1 %v2409_v7  ;;  %v2476_v7 = vld [vmem:[#allocation8 + $0x168] ss:$16 sps:$4 sm:$0xff]  }
  0x9d   :  { %663 = vmatpush1.bf16.msra.mxu0 %v2397_v1  ;;  %v2472_v1 = vld [vmem:[#allocation8 + $0x14c] ss:$16 sps:$4 sm:$0xff]  }
  0x9e   :  { %664 = vmatprep.subr.bf16.mxu0 %v2405_v4  ;;  %v2475_v4 = vld [vmem:[#allocation8 + $0x164] ss:$16 sps:$4 sm:$0xff]  }
  0xa1   :  { %665 = vmatpush1.bf16.msra.mxu0 %v2403_v5  ;;  %v2478_v5 = vld [vmem:[#allocation8 + $0x16c] ss:$16 sps:$4 sm:$0xff]  }
  0xa2   :  { %1555 = vmatprep.subr.bf16.mxu0 %v2412_v8  ;;  %v2481_v8 = vld [vmem:[#allocation8 + $0x184] ss:$16 sps:$4 sm:$0xff]  }
 0x137   :  { %v176_v16 = vpop.f32.mrb[0].mxu0 }
 0x138   :  { %v177_v17 = vadd.f32 %v176_v16, %v111_v14  ;;  %v178_v18 = vpop.f32.mrb[1].mxu0  ;;  %v2482_v14 = vld [vmem:[#allocation8 + $0x188] ss:$16 sps:$4 sm:$0xff]   ;;  %v2490_v16 = vld [vmem:[#allocation8 + $0x1ac] ss:$16 sps:$4 sm:$0xff]  }
 0x139   :  { %v179_v19 = vadd.f32 %v178_v18, %v115_v15  ;;  %v180_v20 = vpop.f32.mrb[2].mxu0  ;;  %v2487_v15 = vld [vmem:[#allocation8 + $0x1a4] ss:$16 sps:$4 sm:$0xff]   ;;  %v2488_v18 = vld [vmem:[#allocation8 + $0x1a8] ss:$16 sps:$4 sm:$0xff]  }
 0x13a   :  { %v183_v21 = vmax.f32 %v177_v17, 0.0  ;;  %v181_v22 = vpop.f32.mrb[3].mxu0  ;;  %v2485_v17 = vld [vmem:[#allocation8 + $0x1a0] ss:$16 sps:$4 sm:$0xff]   ;;  %v2496_v20 = vld [vmem:[#allocation8 + $0x1cc] ss:$16 sps:$4 sm:$0xff]  }
 0x13b   :  { %v184_v23 = vmax.f32 %v179_v19, 0.0  ;;  %v2493_v19 = vld [vmem:[#allocation8 + $0x1c4] ss:$16 sps:$4 sm:$0xff]   ;;  %v2494_v22 = vld [vmem:[#allocation8 + $0x1c8] ss:$16 sps:$4 sm:$0xff]  }
 0x13c   :  { %v185_v27 = vpack.c.bf16 %v183_v21, %v183_v21  ;;  %v2491_v21 = vld [vmem:[#allocation8 + $0x1c0] ss:$16 sps:$4 sm:$0xff]  }
 0x13d   :  { %v186_v24 = vpack.c.bf16 %v184_v23, %v184_v23  ;;  %v2499_v23 = vld [vmem:[#allocation8 + $0x1e4] ss:$16 sps:$4 sm:$0xff]  }
 0x13f   :  { %625 = vmatprep.mubr.bf16.mxu1 %v186_v24  ;;  %666 = vmatprep.mubr.bf16.mxu0 %v186_v24  ;;  %v2502_v24 = vld [vmem:[#allocation8 + $0x1ec] ss:$16 sps:$4 sm:$0xff]  }
 0x140   :  { %626 = vmatmul.mubr.bf16.vlgmr.msra.gmra.mrb[0].mxu1 %v185_v27  ;;  %667 = vmatmul.mubr.bf16.vlgmr.msra.gmra.mrb[4].mxu0 %v185_v27  ;;  %v2505_v27 = vld [vmem:[#allocation8 + $0x204] ss:$16 sps:$4 sm:$0xff]  }
 0x141   :  { %1474 = vmatpush1.bf16.msra.mxu1 %v2407_v25  ;;  %1556 = vmatpush1.bf16.msra.mxu0 %v2410_v26  ;;  %v2497_v25 = vld [vmem:[#allocation8 + $0x1e0] ss:$16 sps:$4 sm:$0xff]   ;;  %v2500_v26 = vld [vmem:[#allocation8 + $0x1e8] ss:$16 sps:$4 sm:$0xff]  }
 0x142   :  { %1475 = vmatprep.subr.bf16.mxu1 %v2415_v28  ;;  %1557 = vmatprep.subr.bf16.mxu0 %v2418_v29  ;;  %v2508_v28 = vld [vmem:[#allocation8 + $0x20c] ss:$16 sps:$4 sm:$0xff]   ;;  %v2916_v29 = vld [vmem:[%s2961_s4] sm:$0xf] }
 0x145   :  { %1476 = vmatpush1.bf16.msra.mxu1 %v2413_v30  ;;  %1558 = vmatpush1.bf16.msra.mxu0 %v2416_v31  ;;  %v267_v30 = vsub.s32 3, %v2900_v10  ;;  %v256_v31 = vrot.slane %v2916_v29, %v2903_v11 }
 0x146   :  { %1477 = vmatprep.subr.bf16.mxu1 %v2421_v32  ;;  %1559 = vmatprep.subr.bf16.mxu0 %v2424_v33  ;;  %v260_v32 = vrot.slane %v2916_v29, %v2909_v13 }
 0x147   :  { %v268_v33 = vrot.slane %v2916_v29, %v267_v30 }
 0x149   :  { %1478 = vmatpush1.bf16.msra.mxu1 %v2419_v34  ;;  %1560 = vmatpush1.bf16.msra.mxu0 %v2422_v35 }
 0x14a   :  { %1479 = vmatprep.subr.bf16.mxu1 %v2427_v36  ;;  %1561 = vmatprep.subr.bf16.mxu0 %v2430_v37 }
 0x14d   :  { %1480 = vmatpush1.bf16.msra.mxu1 %v2425_v38  ;;  %1562 = vmatpush1.bf16.msra.mxu0 %v2428_v39 }
 0x14e   :  { %1481 = vmatprep.subr.bf16.mxu1 %v2433_v40  ;;  %1563 = vmatprep.subr.bf16.mxu0 %v2436_v41 }
 0x151   :  { %1482 = vmatpush1.bf16.msra.mxu1 %v2431_v42  ;;  %1564 = vmatpush1.bf16.msra.mxu0 %v2434_v43 }
 0x152   :  { %1483 = vmatprep.subr.bf16.mxu1 %v2439_v44  ;;  %1565 = vmatprep.subr.bf16.mxu0 %v2442_v45 }
 0x155   :  { %1484 = vmatpush1.bf16.msra.mxu1 %v2437_v46  ;;  %1566 = vmatpush1.bf16.msra.mxu0 %v2440_v47 }
 0x156   :  { %1485 = vmatprep.subr.bf16.mxu1 %v2445_v48  ;;  %1567 = vmatprep.subr.bf16.mxu0 %v2448_v49  ;;  %v2503_v49 = vld [vmem:[#allocation8 + $0x200] ss:$16 sps:$4 sm:$0xff]  }
 0x159   :  { %1486 = vmatpush1.bf16.msra.mxu1 %v2443_v50  ;;  %1568 = vmatpush1.bf16.msra.mxu0 %v2446_v51  ;;  %v2506_v50 = vld [vmem:[#allocation8 + $0x208] ss:$16 sps:$4 sm:$0xff]  }
 0x15a   :  { %1487 = vmatprep.subr.bf16.mxu1 %v2451_v52  ;;  %1569 = vmatprep.subr.bf16.mxu0 %v2454_v53  ;;  %v2511_v52 = vld [vmem:[#allocation8 + $0x224] ss:$16 sps:$4 sm:$0xff]   ;;  %v2514_v53 = vld [vmem:[#allocation8 + $0x22c] ss:$16 sps:$4 sm:$0xff]  }
 0x15d   :  { %1488 = vmatpush1.bf16.msra.mxu1 %v2449_v54  ;;  %1570 = vmatpush1.bf16.msra.mxu0 %v2452_v55  ;;  %v2509_v55 = vld [vmem:[#allocation8 + $0x220] ss:$16 sps:$4 sm:$0xff]  }
 0x15e   :  { %1489 = vmatprep.subr.bf16.mxu1 %v2457_v56  ;;  %1571 = vmatprep.subr.bf16.mxu0 %v2460_v57  ;;  %v2512_v56 = vld [vmem:[#allocation8 + $0x228] ss:$16 sps:$4 sm:$0xff]   ;;  %v2517_v57 = vld [vmem:[#allocation8 + $0x244] ss:$16 sps:$4 sm:$0xff]  }
 0x161   :  { %1490 = vmatpush1.bf16.msra.mxu1 %v2455_v58  ;;  %1572 = vmatpush1.bf16.msra.mxu0 %v2458_v59  ;;  %v2520_v58 = vld [vmem:[#allocation8 + $0x24c] ss:$16 sps:$4 sm:$0xff]   ;;  %v2515_v59 = vld [vmem:[#allocation8 + $0x240] ss:$16 sps:$4 sm:$0xff]  }
 0x162   :  { %1491 = vmatprep.subr.bf16.mxu1 %v2463_v60  ;;  %1573 = vmatprep.subr.bf16.mxu0 %v2466_v61  ;;  %v2518_v60 = vld [vmem:[#allocation8 + $0x248] ss:$16 sps:$4 sm:$0xff]   ;;  %v2523_v61 = vld [vmem:[#allocation8 + $0x264] ss:$16 sps:$4 sm:$0xff]  }
 0x165   :  { %1492 = vmatpush1.bf16.msra.mxu1 %v2461_v62  ;;  %1574 = vmatpush1.bf16.msra.mxu0 %v2464_v63  ;;  %v2526_v62 = vld [vmem:[#allocation8 + $0x26c] ss:$16 sps:$4 sm:$0xff]   ;;  %v2521_v63 = vld [vmem:[#allocation8 + $0x260] ss:$16 sps:$4 sm:$0xff]  }
 0x166   :  { %1493 = vmatprep.subr.bf16.mxu1 %v2469_v0  ;;  %1575 = vmatprep.subr.bf16.mxu0 %v2472_v1  ;;  %v2524_v0 = vld [vmem:[#allocation8 + $0x268] ss:$16 sps:$4 sm:$0xff]   ;;  %v2529_v1 = vld [vmem:[#allocation8 + $0x284] ss:$16 sps:$4 sm:$0xff]  }
 0x169   :  { %1494 = vmatpush1.bf16.msra.mxu1 %v2467_v2  ;;  %1576 = vmatpush1.bf16.msra.mxu0 %v2470_v3  ;;  %v2532_v2 = vld [vmem:[#allocation8 + $0x28c] ss:$16 sps:$4 sm:$0xff]   ;;  %v2527_v3 = vld [vmem:[#allocation8 + $0x280] ss:$16 sps:$4 sm:$0xff]  }
 0x16a   :  { %1495 = vmatprep.subr.bf16.mxu1 %v2475_v4  ;;  %1577 = vmatprep.subr.bf16.mxu0 %v2478_v5  ;;  %v2530_v4 = vld [vmem:[#allocation8 + $0x288] ss:$16 sps:$4 sm:$0xff]   ;;  %v2535_v5 = vld [vmem:[#allocation8 + $0x2a4] ss:$16 sps:$4 sm:$0xff]  }
 0x16d   :  { %1496 = vmatpush1.bf16.msra.mxu1 %v2473_v6  ;;  %1578 = vmatpush1.bf16.msra.mxu0 %v2476_v7  ;;  %v2538_v6 = vld [vmem:[#allocation8 + $0x2ac] ss:$16 sps:$4 sm:$0xff]   ;;  %v2533_v7 = vld [vmem:[#allocation8 + $0x2a0] ss:$16 sps:$4 sm:$0xff]  }
 0x16e   :  { %1497 = vmatprep.subr.bf16.mxu1 %v2481_v8  ;;  %1579 = vmatprep.subr.bf16.mxu0 %v2484_v9  ;;  %v2536_v8 = vld [vmem:[#allocation8 + $0x2a8] ss:$16 sps:$4 sm:$0xff]   ;;  %v2541_v9 = vld [vmem:[#allocation8 + $0x2c4] ss:$16 sps:$4 sm:$0xff]  }
 0x171   :  { %1498 = vmatpush1.bf16.msra.mxu1 %v2479_v12  ;;  %1580 = vmatpush1.bf16.msra.mxu0 %v2482_v14  ;;  %v2544_v12 = vld [vmem:[#allocation8 + $0x2cc] ss:$16 sps:$4 sm:$0xff]   ;;  %v2539_v14 = vld [vmem:[#allocation8 + $0x2c0] ss:$16 sps:$4 sm:$0xff]  }
 0x172   :  { %1499 = vmatprep.subr.bf16.mxu1 %v2487_v15  ;;  %1581 = vmatprep.subr.bf16.mxu0 %v2490_v16  ;;  %v2542_v15 = vld [vmem:[#allocation8 + $0x2c8] ss:$16 sps:$4 sm:$0xff]   ;;  %v2547_v16 = vld [vmem:[#allocation8 + $0x2e4] ss:$16 sps:$4 sm:$0xff]  }
 0x175   :  { %1500 = vmatpush1.bf16.msra.mxu1 %v2485_v17  ;;  %1582 = vmatpush1.bf16.msra.mxu0 %v2488_v18  ;;  %v2550_v17 = vld [vmem:[#allocation8 + $0x2ec] ss:$16 sps:$4 sm:$0xff]   ;;  %v2545_v18 = vld [vmem:[#allocation8 + $0x2e0] ss:$16 sps:$4 sm:$0xff]  }
 0x176   :  { %1501 = vmatprep.subr.bf16.mxu1 %v2493_v19  ;;  %1583 = vmatprep.subr.bf16.mxu0 %v2496_v20  ;;  %v2548_v19 = vld [vmem:[#allocation8 + $0x2e8] ss:$16 sps:$4 sm:$0xff]   ;;  %v2553_v20 = vld [vmem:[#allocation8 + $0x304] ss:$16 sps:$4 sm:$0xff]  }
 0x179   :  { %1502 = vmatpush1.bf16.msra.mxu1 %v2491_v21  ;;  %1584 = vmatpush1.bf16.msra.mxu0 %v2494_v22  ;;  %v2556_v21 = vld [vmem:[#allocation8 + $0x30c] ss:$16 sps:$4 sm:$0xff]   ;;  %v2551_v22 = vld [vmem:[#allocation8 + $0x300] ss:$16 sps:$4 sm:$0xff]  }
 0x17a   :  { %1503 = vmatprep.subr.bf16.mxu1 %v2499_v23  ;;  %1585 = vmatprep.subr.bf16.mxu0 %v2502_v24  ;;  %v2554_v23 = vld [vmem:[#allocation8 + $0x308] ss:$16 sps:$4 sm:$0xff]   ;;  %v2559_v24 = vld [vmem:[#allocation8 + $0x324] ss:$16 sps:$4 sm:$0xff]  }
 0x17d   :  { %1504 = vmatpush1.bf16.msra.mxu1 %v2497_v25  ;;  %1586 = vmatpush1.bf16.msra.mxu0 %v2500_v26  ;;  %v2562_v25 = vld [vmem:[#allocation8 + $0x32c] ss:$16 sps:$4 sm:$0xff]   ;;  %v2557_v26 = vld [vmem:[#allocation8 + $0x320] ss:$16 sps:$4 sm:$0xff]  }
 0x17e   :  { %1514 = vmatprep.subr.bf16.mxu1 %v2505_v27  ;;  %1596 = vmatprep.subr.bf16.mxu0 %v2508_v28  ;;  %v2560_v27 = vld [vmem:[#allocation8 + $0x328] ss:$16 sps:$4 sm:$0xff]   ;;  %v2565_v28 = vld [vmem:[#allocation8 + $0x344] ss:$16 sps:$4 sm:$0xff]  }
 0x213   :  { %v627_v34 = vpop.f32.mrb[0].mxu1  ;;  %v2926_v35 = vpop.f32.mrb[4].mxu0 }
 0x214   :  { %v628_v36 = vadd.f32 %v627_v34, %v256_v31  ;;  %v629_v37 = vpop.f32.mrb[1].mxu1  ;;  %v670_v38 = vpop.f32.mrb[5].mxu0  ;;  %v2568_v31 = vld [vmem:[#allocation8 + $0x34c] ss:$16 sps:$4 sm:$0xff]   ;;  %v2571_v34 = vld [vmem:[#allocation8 + $0x364] ss:$16 sps:$4 sm:$0xff]  }
 0x215   :  { %v630_v39 = vadd.f32 %v629_v37, %v260_v32  ;;  %v671_v40 = vadd.f32 %v670_v38, %v268_v33  ;;  %v631_v41 = vpop.f32.mrb[2].mxu1  ;;  %v672_v42 = vpop.f32.mrb[6].mxu0  ;;  %v2563_v32 = vld [vmem:[#allocation8 + $0x340] ss:$16 sps:$4 sm:$0xff]   ;;  %v2566_v33 = vld [vmem:[#allocation8 + $0x348] ss:$16 sps:$4 sm:$0xff]  }
 0x216   :  { %v675_v43 = vmax.f32 %v628_v36, 0.0  ;;  %v632_v44 = vpop.f32.mrb[3].mxu1  ;;  %v673_v45 = vpop.f32.mrb[7].mxu0  ;;  %v2574_v36 = vld [vmem:[#allocation8 + $0x36c] ss:$16 sps:$4 sm:$0xff]  }
 0x217   :  { %v676_v46 = vmax.f32 %v630_v39, 0.0  ;;  %v678_v47 = vmax.f32 %v671_v40, 0.0  ;;  %v2569_v37 = vld [vmem:[#allocation8 + $0x360] ss:$16 sps:$4 sm:$0xff]   ;;  %v2572_v38 = vld [vmem:[#allocation8 + $0x368] ss:$16 sps:$4 sm:$0xff]  }
 0x218   :  { %v679_v51 = vpack.c.bf16 %v675_v43, %v675_v43  ;;  %v2577_v39 = vld [vmem:[#allocation8 + $0x384] ss:$16 sps:$4 sm:$0xff]   ;;  %v2580_v40 = vld [vmem:[#allocation8 + $0x38c] ss:$16 sps:$4 sm:$0xff]   ;;  %v2575_v41 = vld [vmem:[#allocation8 + $0x380] ss:$16 sps:$4 sm:$0xff]  }
 0x219   :  { %v680_v48 = vpack.c.bf16 %v676_v46, %v676_v46  ;;  %v682_v54 = vpack.c.bf16 %v678_v47, %v678_v47  ;;  %v2578_v42 = vld [vmem:[#allocation8 + $0x388] ss:$16 sps:$4 sm:$0xff]   ;;  %v263_v43 = vsub.s32 2, %v2900_v10  ;;  %v2583_v44 = vld [vmem:[#allocation8 + $0x3a4] ss:$16 sps:$4 sm:$0xff]  }
 0x21a   :  { %v2586_v45 = vld [vmem:[#allocation8 + $0x3ac] ss:$16 sps:$4 sm:$0xff]   ;;  %v2581_v46 = vld [vmem:[#allocation8 + $0x3a0] ss:$16 sps:$4 sm:$0xff]   ;;  %v2584_v47 = vld [vmem:[#allocation8 + $0x3a8] ss:$16 sps:$4 sm:$0xff]  }
 0x21b   :  { %1505 = vmatprep.mubr.bf16.mxu1 %v680_v48  ;;  %1587 = vmatprep.mubr.bf16.mxu0 %v680_v48  ;;  %v264_v48 = vrot.slane %v2916_v29, %v263_v43  ;;  %v2599_v29 = vld [vmem:[#allocation10 + $0x40] sm:$0xff]  }
 0x21c   :  { %1506 = vmatmul.mubr.bf16.vlgmr.msra.gmra.mrb[4].mxu1 %v679_v51  ;;  %1588 = vmatmul.mubr.bf16.vlgmr.msra.gmra.mrb[8].mxu0 %v679_v51  ;;  %v2587_v51 = vld [vmem:[#allocation8 + $0x3c0] ss:$16 sps:$4 sm:$0xff]  }
 0x21d   :  { %1515 = vmatpush1.bf16.msra.mxu1 %v2503_v49  ;;  %1597 = vmatpush1.bf16.msra.mxu0 %v2506_v50  ;;  %v2589_v49 = vld [vmem:[#allocation8 + $0x3c4] ss:$16 sps:$4 sm:$0xff]   ;;  %v2592_v50 = vld [vmem:[#allocation8 + $0x3cc] ss:$16 sps:$4 sm:$0xff]  }
 0x21e   :  { %1546 = vmatprep.mubr.bf16.mxu1 %v682_v54  ;;  %1628 = vmatprep.mubr.bf16.mxu0 %v682_v54  ;;  %v2595_v54 = vld [vmem:[#allocation8 + $0x3e4] ss:$16 sps:$4 sm:$0xff]  }
 0x21f   :  { %1516 = vmatprep.subr.bf16.mxu1 %v2511_v52  ;;  %1598 = vmatprep.subr.bf16.mxu0 %v2514_v53  ;;  %v2590_v52 = vld [vmem:[#allocation8 + $0x3c8] ss:$16 sps:$4 sm:$0xff]   ;;  %v669_v53 = vadd.f32 %v2926_v35, %v264_v48 }
 0x220   :  { %v2603_v35 = vld [vmem:[#allocation10 + $0x48] sm:$0xff]  }
 0x221   :  { %1517 = vmatpush1.bf16.msra.mxu1 %v2509_v55  ;;  %1599 = vmatpush1.bf16.msra.mxu0 %v2512_v56  ;;  %v2598_v55 = vld [vmem:[#allocation8 + $0x3ec] ss:$16 sps:$4 sm:$0xff]   ;;  %v2593_v56 = vld [vmem:[#allocation8 + $0x3e0] ss:$16 sps:$4 sm:$0xff]  }
 0x222   :  { %1518 = vmatprep.subr.bf16.mxu1 %v2517_v57  ;;  %1600 = vmatprep.subr.bf16.mxu0 %v2520_v58  ;;  %v2596_v57 = vld [vmem:[#allocation8 + $0x3e8] ss:$16 sps:$4 sm:$0xff]   ;;  %v677_v58 = vmax.f32 %v669_v53, 0.0 }
 0x225   :  { %1519 = vmatpush1.bf16.msra.mxu1 %v2515_v59  ;;  %1601 = vmatpush1.bf16.msra.mxu0 %v2518_v60  ;;  %v2600_v59 = vld [vmem:[#allocation10 + $0xc0] sm:$0xff]  }
 0x226   :  { %1520 = vmatprep.subr.bf16.mxu1 %v2523_v61  ;;  %1602 = vmatprep.subr.bf16.mxu0 %v2526_v62  ;;  %v2601_v60 = vld [vmem:[#allocation10] sm:$0xff]   ;;  %v681_v62 = vpack.c.bf16 %v677_v58, %v677_v58 }
 0x227   :  { %v2602_v61 = vld [vmem:[#allocation10 + $0x80] sm:$0xff]  }
 0x229   :  { %1521 = vmatpush1.bf16.msra.mxu1 %v2521_v63  ;;  %1603 = vmatpush1.bf16.msra.mxu0 %v2524_v0  ;;  %v2604_v63 = vld [vmem:[#allocation10 + $0xc8] sm:$0xff]  }
 0x22a   :  { %1522 = vmatprep.subr.bf16.mxu1 %v2529_v1  ;;  %1604 = vmatprep.subr.bf16.mxu0 %v2532_v2  ;;  %v2605_v0 = vld [vmem:[#allocation10 + $0x8] sm:$0xff]   ;;  %v2607_v2 = vld [vmem:[#allocation10 + $0x50] sm:$0xff]  }
 0x22b   :  { %v2606_v1 = vld [vmem:[#allocation10 + $0x88] sm:$0xff]  }
 0x22d   :  { %1523 = vmatpush1.bf16.msra.mxu1 %v2527_v3  ;;  %1605 = vmatpush1.bf16.msra.mxu0 %v2530_v4  ;;  %v2608_v3 = vld [vmem:[#allocation10 + $0xd0] sm:$0xff]  }
 0x22e   :  { %1524 = vmatprep.subr.bf16.mxu1 %v2535_v5  ;;  %1606 = vmatprep.subr.bf16.mxu0 %v2538_v6  ;;  %v2609_v4 = vld [vmem:[#allocation10 + $0x10] sm:$0xff]   ;;  %v2611_v6 = vld [vmem:[#allocation10 + $0x58] sm:$0xff]  }
 0x22f   :  { %v2610_v5 = vld [vmem:[#allocation10 + $0x90] sm:$0xff]  }
 0x231   :  { %1525 = vmatpush1.bf16.msra.mxu1 %v2533_v7  ;;  %1607 = vmatpush1.bf16.msra.mxu0 %v2536_v8  ;;  %v2612_v7 = vld [vmem:[#allocation10 + $0xd8] sm:$0xff]  }
 0x232   :  { %1526 = vmatprep.subr.bf16.mxu1 %v2541_v9  ;;  %1608 = vmatprep.subr.bf16.mxu0 %v2544_v12  ;;  %v2613_v8 = vld [vmem:[#allocation10 + $0x18] sm:$0xff]   ;;  %v2615_v12 = vld [vmem:[#allocation10 + $0x60] sm:$0xff]  }
 0x233   :  { %v2614_v9 = vld [vmem:[#allocation10 + $0x98] sm:$0xff]  }
 0x235   :  { %1527 = vmatpush1.bf16.msra.mxu1 %v2539_v14  ;;  %1609 = vmatpush1.bf16.msra.mxu0 %v2542_v15  ;;  %v2616_v14 = vld [vmem:[#allocation10 + $0xe0] sm:$0xff]  }
 0x236   :  { %1528 = vmatprep.subr.bf16.mxu1 %v2547_v16  ;;  %1610 = vmatprep.subr.bf16.mxu0 %v2550_v17  ;;  %v2617_v15 = vld [vmem:[#allocation10 + $0x20] sm:$0xff]   ;;  %v2619_v17 = vld [vmem:[#allocation10 + $0x68] sm:$0xff]  }
 0x237   :  { %v2618_v16 = vld [vmem:[#allocation10 + $0xa0] sm:$0xff]  }
 0x239   :  { %1529 = vmatpush1.bf16.msra.mxu1 %v2545_v18  ;;  %1611 = vmatpush1.bf16.msra.mxu0 %v2548_v19  ;;  %v2620_v18 = vld [vmem:[#allocation10 + $0xe8] sm:$0xff]  }
 0x23a   :  { %1530 = vmatprep.subr.bf16.mxu1 %v2553_v20  ;;  %1612 = vmatprep.subr.bf16.mxu0 %v2556_v21  ;;  %v2621_v19 = vld [vmem:[#allocation10 + $0x28] sm:$0xff]   ;;  %v2623_v21 = vld [vmem:[#allocation10 + $0x70] sm:$0xff]  }
 0x23b   :  { %v2622_v20 = vld [vmem:[#allocation10 + $0xa8] sm:$0xff]  }
 0x23d   :  { %1531 = vmatpush1.bf16.msra.mxu1 %v2551_v22  ;;  %1613 = vmatpush1.bf16.msra.mxu0 %v2554_v23  ;;  %v2624_v22 = vld [vmem:[#allocation10 + $0xf0] sm:$0xff]  }
 0x23e   :  { %1532 = vmatprep.subr.bf16.mxu1 %v2559_v24  ;;  %1614 = vmatprep.subr.bf16.mxu0 %v2562_v25  ;;  %v2625_v23 = vld [vmem:[#allocation10 + $0x30] sm:$0xff]   ;;  %v2627_v25 = vld [vmem:[#allocation10 + $0x78] sm:$0xff]  }
 0x23f   :  { %v2626_v24 = vld [vmem:[#allocation10 + $0xb0] sm:$0xff]  }
 0x241   :  { %1533 = vmatpush1.bf16.msra.mxu1 %v2557_v26  ;;  %1615 = vmatpush1.bf16.msra.mxu0 %v2560_v27  ;;  %v2628_v26 = vld [vmem:[#allocation10 + $0xf8] sm:$0xff]  }
 0x242   :  { %1534 = vmatprep.subr.bf16.mxu1 %v2565_v28  ;;  %1616 = vmatprep.subr.bf16.mxu0 %v2568_v31  ;;  %v2629_v27 = vld [vmem:[#allocation10 + $0x38] sm:$0xff]  }
 0x243   :  { %v2630_v28 = vld [vmem:[#allocation10 + $0xb8] sm:$0xff]  }
 0x244   :  { %v811_v31 = vld [vmem:[%s2963_s6] sm:$0xf] }
 0x245   :  { %1535 = vmatpush1.bf16.msra.mxu1 %v2563_v32  ;;  %1617 = vmatpush1.bf16.msra.mxu0 %v2566_v33  ;;  %v816_v32 = vrot.slane %v811_v31, %v2903_v11  ;;  %v824_v33 = vrot.slane %v811_v31, %v263_v43 }
 0x246   :  { %1536 = vmatprep.subr.bf16.mxu1 %v2571_v34  ;;  %1618 = vmatprep.subr.bf16.mxu0 %v2574_v36  ;;  %v820_v34 = vrot.slane %v811_v31, %v2909_v13  ;;  %v828_v36 = vrot.slane %v811_v31, %v267_v30 }
 0x249   :  { %1537 = vmatpush1.bf16.msra.mxu1 %v2569_v37  ;;  %1619 = vmatpush1.bf16.msra.mxu0 %v2572_v38 }
 0x24a   :  { %1538 = vmatprep.subr.bf16.mxu1 %v2577_v39  ;;  %1620 = vmatprep.subr.bf16.mxu0 %v2580_v40 }
 0x24d   :  { %1539 = vmatpush1.bf16.msra.mxu1 %v2575_v41  ;;  %1621 = vmatpush1.bf16.msra.mxu0 %v2578_v42 }
 0x24e   :  { %1540 = vmatprep.subr.bf16.mxu1 %v2583_v44  ;;  %1622 = vmatprep.subr.bf16.mxu0 %v2586_v45 }
 0x251   :  { %1541 = vmatpush1.bf16.msra.mxu1 %v2581_v46  ;;  %1623 = vmatpush1.bf16.msra.mxu0 %v2584_v47 }
 0x252   :  { %1542 = vmatprep.subr.bf16.mxu1 %v2589_v49  ;;  %1624 = vmatprep.subr.bf16.mxu0 %v2592_v50 }
 0x255   :  { %1543 = vmatpush1.bf16.msra.mxu1 %v2587_v51  ;;  %1625 = vmatpush1.bf16.msra.mxu0 %v2590_v52 }
 0x256   :  { %1544 = vmatprep.subr.bf16.mxu1 %v2595_v54  ;;  %1626 = vmatprep.subr.bf16.mxu0 %v2598_v55  ;;  %v2203_v55 = vld [vmem:[%s2965_s8] ss:$0 sm:$0xff] }
 0x259   :  { %1545 = vmatpush1.bf16.msra.mxu1 %v2593_v56  ;;  %1627 = vmatpush1.bf16.msra.mxu0 %v2596_v57 }
 0x25a   :  { %2236 = vmatprep.subr.bf16.mxu1 %v2599_v29  ;;  %2258 = vmatprep.subr.bf16.mxu0 %v2600_v59 }
 0x25c   :  { %1547 = vmatmul.mubr.bf16.vlgmr.msra.gmra.mrb[4].mxu1 %v681_v62  ;;  %1629 = vmatmul.mubr.bf16.vlgmr.msra.gmra.mrb[8].mxu0 %v681_v62 }
 0x25d   :  { %2237 = vmatpush3.bf16.msra.mxu1 %v2601_v60  ;;  %2259 = vmatpush3.bf16.msra.mxu0 %v2602_v61 }
 0x25e   :  { %2238 = vmatprep.subr.bf16.mxu1 %v2603_v35  ;;  %2260 = vmatprep.subr.bf16.mxu0 %v2604_v63 }
 0x261   :  { %2239 = vmatpush3.bf16.msra.mxu1 %v2605_v0  ;;  %2261 = vmatpush3.bf16.msra.mxu0 %v2606_v1 }
 0x262   :  { %2240 = vmatprep.subr.bf16.mxu1 %v2607_v2  ;;  %2262 = vmatprep.subr.bf16.mxu0 %v2608_v3 }
 0x265   :  { %2241 = vmatpush3.bf16.msra.mxu1 %v2609_v4  ;;  %2263 = vmatpush3.bf16.msra.mxu0 %v2610_v5 }
 0x266   :  { %2242 = vmatprep.subr.bf16.mxu1 %v2611_v6  ;;  %2264 = vmatprep.subr.bf16.mxu0 %v2612_v7 }
 0x269   :  { %2243 = vmatpush3.bf16.msra.mxu1 %v2613_v8  ;;  %2265 = vmatpush3.bf16.msra.mxu0 %v2614_v9 }
 0x26a   :  { %2244 = vmatprep.subr.bf16.mxu1 %v2615_v12  ;;  %2266 = vmatprep.subr.bf16.mxu0 %v2616_v14 }
 0x26d   :  { %2245 = vmatpush3.bf16.msra.mxu1 %v2617_v15  ;;  %2267 = vmatpush3.bf16.msra.mxu0 %v2618_v16 }
 0x26e   :  { %2246 = vmatprep.subr.bf16.mxu1 %v2619_v17  ;;  %2268 = vmatprep.subr.bf16.mxu0 %v2620_v18 }
 0x271   :  { %2247 = vmatpush3.bf16.msra.mxu1 %v2621_v19  ;;  %2269 = vmatpush3.bf16.msra.mxu0 %v2622_v20 }
 0x272   :  { %2248 = vmatprep.subr.bf16.mxu1 %v2623_v21  ;;  %2270 = vmatprep.subr.bf16.mxu0 %v2624_v22 }
 0x275   :  { %2249 = vmatpush3.bf16.msra.mxu1 %v2625_v23  ;;  %2271 = vmatpush3.bf16.msra.mxu0 %v2626_v24 }
 0x276   :  { %2250 = vmatprep.subr.bf16.mxu1 %v2627_v25  ;;  %2272 = vmatprep.subr.bf16.mxu0 %v2628_v26 }
 0x279   :  { %2251 = vmatpush3.bf16.msra.mxu1 %v2629_v27  ;;  %2273 = vmatpush3.bf16.msra.mxu0 %v2630_v28 }
 0x32f   :  { %v1548_v37 = vpop.f32.mrb[4].mxu1  ;;  %v1630_v38 = vpop.f32.mrb[8].mxu0 }
 0x330   :  { %v2280_v39 = vadd.f32 %v1548_v37, %v816_v32  ;;  %v2282_v40 = vadd.f32 %v1630_v38, %v824_v33  ;;  %v1550_v41 = vpop.f32.mrb[5].mxu1  ;;  %v1632_v42 = vpop.f32.mrb[9].mxu0 }
 0x331   :  { %v2281_v44 = vadd.f32 %v1550_v41, %v820_v34  ;;  %v2283_v45 = vadd.f32 %v1632_v42, %v828_v36  ;;  %v1552_v46 = vpop.f32.mrb[6].mxu1  ;;  %v1634_v47 = vpop.f32.mrb[10].mxu0 }
 0x332   :  { %v1637_v48 = vmax.f32 %v2280_v39, 0.0  ;;  %v1639_v11 = vmax.f32 %v2282_v40, 0.0  ;;  %v1553_v49 = vpop.f32.mrb[7].mxu1  ;;  %v1635_v50 = vpop.f32.mrb[11].mxu0 }
 0x333   :  { %v1638_v43 = vmax.f32 %v2281_v44, 0.0  ;;  %v1640_v51 = vmax.f32 %v2283_v45, 0.0 }
 0x334   :  { %v1641_v10 = vpack.c.bf16 %v1637_v48, %v1637_v48  ;;  %v1643_v30 = vpack.c.bf16 %v1639_v11, %v1639_v11 }
 0x335   :  { %v1642_v13 = vpack.c.bf16 %v1638_v43, %v1638_v43  ;;  %v1644_v52 = vpack.c.bf16 %v1640_v51, %v1640_v51 }
 0x337   :  { %1940 = vmatprep.mubr.bf16.mxu1 %v1642_v13  ;;  %1980 = vmatprep.mubr.bf16.mxu0 %v1644_v52 }
 0x338   :  { %1941 = vmatmul.mubr.bf16.vlgmr.msra.gmra.mrb[8].mxu1 %v1641_v10  ;;  %1981 = vmatmul.mubr.bf16.vlgmr.msra.gmra.mrb[12].mxu0 %v1643_v30 }
 0x40b   :  { %v2252_v53 = vpop.f32.mrb[8].mxu1  ;;  %v2274_v54 = vpop.f32.mrb[12].mxu0 }
 0x40c   :  { %v2253_v56 = vpop.f32.mrb[9].mxu1  ;;  %v2275_v57 = vpop.f32.mrb[13].mxu0 }
 0x40d   :  { %v2254_v58 = vadd.f32 %v2253_v56, %v2252_v53  ;;  %v2276_v29 = vadd.f32 %v2275_v57, %v2274_v54  ;;  %v2255_v59 = vpop.f32.mrb[10].mxu1  ;;  %v2277_v60 = vpop.f32.mrb[14].mxu0 }
 0x40e   :  { %v2256_v61 = vpop.f32.mrb[11].mxu1  ;;  %v2278_v62 = vpop.f32.mrb[15].mxu0 }
 0x40f   :  { %v1943_v35 = vadd.f32 %v2254_v58, %v2203_v55 }
 0x411   :  { %v1983_v63 = vadd.f32 %v2276_v29, %v1943_v35 }
 0x413   :  { %1988 = vst [vmem:[#allocation11] sm:$0xff] %v1983_v63 }
 0x414   :  { %2752 = shalt.err (!%p2749_p2)
}
 0x415   :  { %s2753_s16 = scalar_lea.hbm %s2966_s9, 128 }
 0x416   :  { %p2754_p3 = scmp.ne.s32.totalorder %s2966_s9, %s2753_s16  ;;  %p2757_p4 = scmp.lt.u32.totalorder %s2753_s16, %s2966_s9 }
 0x418   :  { %p2759_p5 = pnand %p2757_p4, %p2754_p3 }
 0x41a   :  { %2762 = shalt.err (!%p2759_p5)
}
 0x41b   :  { %1998 = dma.vmem_to_hbm [thread:$0]  %s1996_s13, 128, %s2966_s9, [#allocation4]  }
 0x41c   :  { %2769 = dma.done.wait [#allocation4], 128  }
 0x41d   :  { %2770 = vsyncadd [#allocation4], 4294967168 }
 0x41e   :  { %2002 = vsyncpa [#allocation3], 1 }
 0x41f   :  { %2003 = vsyncpa [#allocation6], 1 }
 0x420   :  { %2004 = vsyncpa [#allocation9], 1 }
 0x421   :  { %2005 = vsyncpa [#allocation4], 1 }

</bundles_post_ra>
